<compile_context>
chip_gen: v6e
topology: v6e:2x2x1
jax: 0.10.0
libtpu: 0.0.40
codegen_flags: <defaults>
</compile_context>

<pallas_src>
import functools

import jax
import jax.numpy as jnp
from jax.experimental import pallas as pl
from jax.experimental.pallas import tpu as pltpu


def _focal_loss_kernel(logits_ref, target_ref, out_ref, acc_ref, *, gamma, n, tm):
    i = pl.program_id(0)

    @pl.when(i == 0)
    def _():
        acc_ref[...] = jnp.zeros_like(acc_ref)

    x = logits_ref[...].astype(jnp.float32)          # (TM, C) upcast in-kernel
    t = target_ref[...]                              # (TM, 1) int32

    # Stabilized logsumexp over the class (lane) axis.
    m = jnp.max(x, axis=-1, keepdims=True)                           # (TM, 1)
    sumexp = jnp.sum(jnp.exp(x - m), axis=-1, keepdims=True)         # (TM, 1)
    lse = jnp.log(sumexp) + m                                        # (TM, 1)

    # x[target] via one-hot select + lane reduce (no vector gather on TPU).
    cols = jax.lax.broadcasted_iota(jnp.int32, x.shape, 1)           # (TM, C)
    x_t = jnp.sum(jnp.where(cols == t, x, 0.0), axis=-1, keepdims=True)  # (TM, 1)

    nll = lse - x_t                                                  # (TM, 1)

    # Mask out padded rows (last tile when N is not a multiple of TM).
    row = jax.lax.broadcasted_iota(jnp.int32, (tm, 1), 0) + i * tm
    nll = jnp.where(row < n, nll, 0.0)

    acc_ref[...] = acc_ref[...] + jnp.sum(nll, keepdims=True)        # (1, 1)

    @pl.when(i == pl.num_programs(0) - 1)
    def _():
        ce = acc_ref[...] / jnp.float32(n)            # (1, 1) mean over N
        pt = jnp.exp(-ce)
        one_m = 1.0 - pt
        g = float(gamma)
        if g == 2.0:
            factor = one_m * one_m
        elif g == float(int(g)) and g >= 0.0:
            factor = jnp.ones_like(one_m)
            for _ in range(int(g)):
                factor = factor * one_m
        else:
            factor = jnp.exp(jnp.float32(g) * jnp.log(one_m))
        out_ref[...] = (factor * ce).astype(jnp.float32)


def focal_loss(logits, target, gamma=2.0, block_rows=None):
    """logits: (N, C) float (any float dtype); target: (N,) int class indices.

    Returns a scalar float32 focal loss (weight=None, reduction='mean').
    """
    n, c = logits.shape
    target2d = target.astype(jnp.int32).reshape(n, 1)

    itemsize = jnp.dtype(logits.dtype).itemsize
    n_pad = ((n + 7) // 8) * 8

    if block_rows is None:
        # Conservative logits-tile budget (x2 for double buffering); fits the
        # 32 MiB scoped-VMEM default on every generation incl. v7x (64 MiB phys).
        vmem_budget = 8 * 1024 * 1024
        c_eff = max(c, 128)  # rows occupy at least one lane-width in VMEM
        tm = vmem_budget // (2 * c_eff * itemsize)
        tm = max(8, min(1024, (tm // 8) * 8))
    else:
        tm = max(8, (block_rows // 8) * 8)
    tm = min(tm, n_pad)

    grid = (pl.cdiv(n, tm),)

    out = pl.pallas_call(
        functools.partial(_focal_loss_kernel, gamma=float(gamma), n=n, tm=tm),
        out_shape=jax.ShapeDtypeStruct((1, 1), jnp.float32),
        grid_spec=pltpu.PrefetchScalarGridSpec(
            num_scalar_prefetch=0,
            grid=grid,
            in_specs=[
                pl.BlockSpec((tm, c), lambda i: (i, 0)),   # logits tile (native dtype)
                pl.BlockSpec((tm, 1), lambda i: (i, 0)),   # targets tile
            ],
            out_specs=pl.BlockSpec((1, 1), lambda i: (0, 0)),  # resident scalar output
            scratch_shapes=[pltpu.VMEM((1, 1), jnp.float32)],  # running sum(nll)
        ),
        compiler_params=pltpu.CompilerParams(
            dimension_semantics=("arbitrary",),  # reduction axis
        ),
        cost_estimate=pl.CostEstimate(
            flops=6 * n * c,
            transcendentals=n * c,
            bytes_accessed=n * c * itemsize + n * 4 + 4,
        ),
    )(logits, target2d)
    return out[0, 0]


def _focal_loss_ref(logits, target, gamma=2.0):
    # Pure-JAX reference for correctness checking.
    logp = jax.nn.log_softmax(logits.astype(jnp.float32), axis=-1)
    nll = -jnp.take_along_axis(logp, target[:, None].astype(jnp.int32), axis=-1)[:, 0]
    ce = jnp.mean(nll)
    pt = jnp.exp(-ce)
    return ((1.0 - pt) ** gamma) * ce


if __name__ == "__main__":
    key = jax.random.PRNGKey(0)
    k1, k2, k3, k4 = jax.random.split(key, 4)

    # Test 1: small f32 case (matches the module's (N, C) cross_entropy input).
    N1, C1 = 8, 16
    logits1 = jax.random.normal(k1, (N1, C1), dtype=jnp.float32)
    target1 = jax.random.randint(k2, (N1,), 0, C1, dtype=jnp.int32)
    out1 = jax.block_until_ready(focal_loss(logits1, target1, gamma=2.0))
    ref1 = _focal_loss_ref(logits1, target1, gamma=2.0)
    assert jnp.allclose(out1, ref1, rtol=1e-5, atol=1e-6), (out1, ref1)

    # Test 2: bf16 logits, N not a multiple of 8 (exercises padding mask),
    # non-integer gamma (exercises the pow path).
    N2, C2 = 20, 10
    logits2 = jax.random.normal(k3, (N2, C2), dtype=jnp.bfloat16)
    target2 = jax.random.randint(k4, (N2,), 0, C2, dtype=jnp.int32)
    out2 = jax.block_until_ready(focal_loss(logits2, target2, gamma=1.5))
    ref2 = _focal_loss_ref(logits2, target2, gamma=1.5)
    assert jnp.allclose(out2, ref2, rtol=1e-4, atol=1e-5), (out2, ref2)

    print("KERNEL_OK")
</pallas_src>

<mosaic_0001>
module attributes {stable_mosaic.version = 11 : i64} {
  func.func @_focal_loss_kernel(%arg0: i32, %arg1: memref<8x16xf32, #tpu.memory_space<vmem>>, %arg2: memref<8x1xi32, #tpu.memory_space<vmem>>, %arg3: memref<1x1xf32, #tpu.memory_space<vmem>>, %arg4: memref<1x1xf32, #tpu.memory_space<vmem>>) attributes {dimension_semantics = [#tpu.dimension_semantics<arbitrary>], iteration_bounds = array<i64: 1>, scalar_prefetch = 0 : i64, scratch_operands = 1 : i64, tpu.core_type = #tpu.core_type<tc>, window_params = [{transform_indices = @transform_0, window_bounds = array<i64: 8, 16>}, {transform_indices = @transform_1, window_bounds = array<i64: 8, 1>}, {pipeline_mode = #tpu.pipeline_mode<synchronous>, transform_indices = @transform_2, window_bounds = array<i64: 1, 1>}]} {
    %c0_i32 = arith.constant 0 : i32
    %0 = arith.cmpi eq, %arg0, %c0_i32 : i32
    %1 = arith.extui %0 : i1 to i32
    %c0_i32_0 = arith.constant 0 : i32
    %2 = arith.cmpi ne, %1, %c0_i32_0 : i32
    scf.if %2 {
      %cst_16 = arith.constant 0.000000e+00 : f32
      %41 = vector.broadcast %cst_16 : f32 to vector<1x1xf32>
      %c0_17 = arith.constant 0 : index
      %c0_18 = arith.constant 0 : index
      %42 = vector.load %arg4[%c0_17, %c0_18] : memref<1x1xf32, #tpu.memory_space<vmem>>, vector<1x1xf32>
      tpu.vector_store %arg4[%c0_17, %c0_18], %41 {strides = array<i32>} : memref<1x1xf32, #tpu.memory_space<vmem>>, vector<1x1xf32>,
    } else {
    }
    %c0 = arith.constant 0 : index
    %c0_1 = arith.constant 0 : index
    %3 = vector.load %arg1[%c0, %c0_1] : memref<8x16xf32, #tpu.memory_space<vmem>>, vector<8x16xf32>
    %c0_2 = arith.constant 0 : index
    %c0_3 = arith.constant 0 : index
    %4 = vector.load %arg2[%c0_2, %c0_3] : memref<8x1xi32, #tpu.memory_space<vmem>>, vector<8x1xi32>
    %cst = arith.constant dense<0xFF800000> : vector<8xf32>
    %5 = vector.multi_reduction <maximumf>, %3, %cst [1] : vector<8x16xf32> to vector<8xf32>
    %6 = vector.shape_cast %5 : vector<8xf32> to vector<8x1xf32>
    %7 = vector.broadcast %6 : vector<8x1xf32> to vector<8x16xf32>
    %8 = arith.subf %3, %7 : vector<8x16xf32>
    %9 = math.exp %8 : vector<8x16xf32>
    %cst_4 = arith.constant dense<0.000000e+00> : vector<8xf32>
    %10 = vector.multi_reduction <add>, %9, %cst_4 [1] : vector<8x16xf32> to vector<8xf32>
    %11 = vector.shape_cast %10 : vector<8xf32> to vector<8x1xf32>
    %12 = math.log %11 : vector<8x1xf32>
    %13 = arith.addf %12, %6 : vector<8x1xf32>
    %14 = tpu.iota {dimensions = array<i32: 1>} : vector<8x16xi32>
    %15 = vector.broadcast %4 : vector<8x1xi32> to vector<8x16xi32>
    %16 = arith.cmpi eq, %14, %15 : vector<8x16xi32>
    %cst_5 = arith.constant 0.000000e+00 : f32
    %17 = vector.broadcast %cst_5 : f32 to vector<8x16xf32>
    %18 = arith.select %16, %3, %17 : vector<8x16xi1>, vector<8x16xf32>
    %cst_6 = arith.constant dense<0.000000e+00> : vector<8xf32>
    %19 = vector.multi_reduction <add>, %18, %cst_6 [1] : vector<8x16xf32> to vector<8xf32>
    %20 = vector.shape_cast %19 : vector<8xf32> to vector<8x1xf32>
    %21 = arith.subf %13, %20 : vector<8x1xf32>
    %22 = tpu.iota {dimensions = array<i32: 0>} : vector<8x1xi32>
    %c8_i32 = arith.constant 8 : i32
    %23 = arith.muli %arg0, %c8_i32 : i32
    %24 = vector.broadcast %23 : i32 to vector<8x1xi32>
    %25 = arith.addi %22, %24 : vector<8x1xi32>
    %c8_i32_7 = arith.constant 8 : i32
    %26 = vector.broadcast %c8_i32_7 : i32 to vector<8x1xi32>
    %27 = arith.cmpi slt, %25, %26 : vector<8x1xi32>
    %cst_8 = arith.constant 0.000000e+00 : f32
    %28 = vector.broadcast %cst_8 : f32 to vector<8x1xf32>
    %29 = arith.select %27, %21, %28 : vector<8x1xi1>, vector<8x1xf32>
    %c0_9 = arith.constant 0 : index
    %c0_10 = arith.constant 0 : index
    %30 = vector.load %arg4[%c0_9, %c0_10] : memref<1x1xf32, #tpu.memory_space<vmem>>, vector<1x1xf32>
    %31 = vector.shape_cast %29 : vector<8x1xf32> to vector<1x8x1xf32>
    %cst_11 = arith.constant dense<0.000000e+00> : vector<1xf32>
    %32 = vector.multi_reduction <add>, %31, %cst_11 [1, 2] : vector<1x8x1xf32> to vector<1xf32>
    %33 = vector.shape_cast %32 : vector<1xf32> to vector<1x1x1xf32>
    %34 = vector.extract %33[0, 0, 0] : f32 from vector<1x1x1xf32>
    %35 = vector.broadcast %34 : f32 to vector<1x1xf32>
    %36 = arith.addf %30, %35 : vector<1x1xf32>
    %c0_12 = arith.constant 0 : index
    %c0_13 = arith.constant 0 : index
    %37 = vector.load %arg4[%c0_12, %c0_13] : memref<1x1xf32, #tpu.memory_space<vmem>>, vector<1x1xf32>
    tpu.vector_store %arg4[%c0_12, %c0_13], %36 {strides = array<i32>} : memref<1x1xf32, #tpu.memory_space<vmem>>, vector<1x1xf32>,
    %c0_i32_14 = arith.constant 0 : i32
    %38 = arith.cmpi eq, %arg0, %c0_i32_14 : i32
    %39 = arith.extui %38 : i1 to i32
    %c0_i32_15 = arith.constant 0 : i32
    %40 = arith.cmpi ne, %39, %c0_i32_15 : i32
    scf.if %40 {
      %c0_16 = arith.constant 0 : index
      %c0_17 = arith.constant 0 : index
      %41 = vector.load %arg4[%c0_16, %c0_17] : memref<1x1xf32, #tpu.memory_space<vmem>>, vector<1x1xf32>
      %cst_18 = arith.constant 8.000000e+00 : f32
      %42 = vector.broadcast %cst_18 : f32 to vector<1x1xf32>
      %43 = arith.divf %41, %42 : vector<1x1xf32>
      %cst_19 = arith.constant 0.000000e+00 : f32
      %44 = vector.broadcast %cst_19 : f32 to vector<1x1xf32>
      %45 = arith.subf %44, %43 : vector<1x1xf32>
      %46 = math.exp %45 : vector<1x1xf32>
      %cst_20 = arith.constant 1.000000e+00 : f32
      %47 = vector.broadcast %cst_20 : f32 to vector<1x1xf32>
      %48 = arith.subf %47, %46 : vector<1x1xf32>
      %49 = arith.mulf %48, %48 : vector<1x1xf32>
      %50 = arith.mulf %49, %43 : vector<1x1xf32>
      %c0_21 = arith.constant 0 : index
      %c0_22 = arith.constant 0 : index
      %51 = vector.load %arg3[%c0_21, %c0_22] : memref<1x1xf32, #tpu.memory_space<vmem>>, vector<1x1xf32>
      tpu.vector_store %arg3[%c0_21, %c0_22], %50 {strides = array<i32>} : memref<1x1xf32, #tpu.memory_space<vmem>>, vector<1x1xf32>,
    } else {
    }
    return
  }
  func.func @transform_0(%arg0: i32) -> (i32, i32) {
    %c0_i32 = arith.constant 0 : i32
    %c0_i32_0 = arith.constant 0 : i32
    return %arg0, %c0_i32 : i32, i32
  }
  func.func @transform_1(%arg0: i32) -> (i32, i32) {
    %c0_i32 = arith.constant 0 : i32
    %c0_i32_0 = arith.constant 0 : i32
    return %arg0, %c0_i32 : i32, i32
  }
  func.func @transform_2(%arg0: i32) -> (i32, i32) {
    %c0_i32 = arith.constant 0 : i32
    %c0_i32_0 = arith.constant 0 : i32
    %c0_i32_1 = arith.constant 0 : i32
    return %c0_i32, %c0_i32_0 : i32, i32
  }
}

</mosaic_0001>

<bundles_post_ra>
// kernel: tpu_custom_call.1
= control target key start
LH: loop header
LB: loop body
LE: loop exit
PB: predicated region body
PF: predicated region fallthrough
CT: control target
= control target key end

     0   :  { %vm20_vm0 = vcmask 130048   ;;  %s161_s0 = inlined_call_operand.vmem [shape: f32[8,16], index: 0, kind: input, shape index: {}]   ;;  %s162_s1 = inlined_call_operand.vmem [shape: s32[8,1], index: 1, kind: input, shape index: {}]   ;;  %s163_s2 = inlined_call_operand.hbm [shape: f32[1,1], index: 2, kind: output, shape index: {}]  }
   0x1   :  { %v18_v0 = vld [vmem:[%s161_s0] sm:$0xff] }
   0x2   :  { %7 = vsyncpa [#allocation4], 0  ;;  %v21_v1 = vsel %vm20_vm0, %v18_v0, -inf  ;;  %v128_v2 = vmov 0   ;;  %v19_v3 = vld [vmem:[%s162_s1] sm:$0xff]  ;;  %v33_v7 = vlaneseq  ;;  %vm52_vm2 = vcmask 7168  }
   0x3   :  { %99 = vset.pattern.permute.xlu0 %v128_v2  ;;  %vm16_vm3 = vcmask 0   ;;  %v129_v21 = vmov 0.0   ;;  %s130_s1 = smov [#allocation3]  }
   0x4   :  { %22 = vmax.xlane.f32.xlu0 %v21_v1  ;;  %v34_v8 = vand.u32 127, %v33_v7  ;;  %17 = vst.msk [vmem:[#allocation2] sm:$0x1] %vm16_vm3, %v129_v21  ;;  %s86_s13 = sshll.u32 %s130_s1, 4  ;;  %s87_s13 = int_to_ptr.vmem [resolvable:$true] %s86_s13 }
   0x5   :  { %s106_s14 = scalar_lea.vmem %s87_s13, 16  ;;  %s110_s15 = scalar_lea.vmem %s87_s13, 32 }
   0x6   :  { %p107_p0 = scmp.ne.s32.totalorder %s87_s13, %s106_s14  ;;  %p111_p1 = scmp.lt.s32.totalorder %s87_s13, %s87_s13 }
   0x7   :  { %p112_p2 = scmp.lt.s32.totalorder %s110_s15, %s106_s14 }
   0x9   :  { %p113_p3 = por %p112_p2, %p111_p1 }
   0xb   :  { %v51_v29 = vld [vmem:[#allocation2] sm:$0x1]  ;;  %p114_p4 = pnand %p113_p3, %p107_p0 }
  0x1a   :  { %36 = vperm.xlu0 %99, %v19_v3  }
  0x8d   :  { %v23_v4 = vpop.xlane.xlu0 %22 }
  0x8e   :  { %v24_v5 = vsub.f32 %v18_v0, %v23_v4 }
  0x90   :  { %v25_v6 = vmul.f32 1.442695, %v24_v5 }
  0x92   :  { %100 = vpow2.f32 %v25_v6 }
  0x95   :  { %v37_v9 = vpop.permute.xlu0 %36 }
  0x96   :  { %vm38_vm1 = vcmp.eq.s32.totalorder %v34_v8, %v37_v9 }
  0x97   :  { %v39_v11 = vsel %vm38_vm1, %v18_v0, 0.0 }
  0x98   :  { %v40_v13 = vsel %vm20_vm0, %v39_v11, 0.0 }
  0x9f   :  { %v101_v10 = vpop.eup %100 }
  0xa0   :  { %v27_v12 = vsel %vm20_vm0, %v101_v10, 0.0 }
  0xa1   :  { %28 = vadd.xlane.f32.xlu1 %v27_v12 }
  0xa5   :  { %41 = vadd.xlane.f32.xlu1 %v40_v13 }
 0x12a   :  { %v29_v14 = vpop.xlane.xlu1 %28 }
 0x12b   :  { %102 = vlog2.f32 %v29_v14 }
 0x12e   :  { %v42_v17 = vpop.xlane.xlu1 %41 }
 0x138   :  { %v103_v15 = vpop.eup %102 }
 0x139   :  { %v31_v16 = vmul.f32 0.6931472, %v103_v15 }
 0x13b   :  { %v32_v18 = vadd.f32 %v31_v16, %v23_v4 }
 0x13d   :  { %v43_v19 = vsub.f32 %v32_v18, %v42_v17 }
 0x13f   :  { %v53_v20 = vsel %vm52_vm2, %v43_v19, 0.0 }
 0x140   :  { %54 = vadd.xlane.f32.xlu1 %v53_v20 }
 0x1c9   :  { %v55_v22 = vpop.xlane.xlu1 %54 }
 0x1ca   :  { %v56_v23 = vrot.slane %v55_v22, 4 }
 0x1cc   :  { %v57_v24 = vadd.f32 %v56_v23, %v55_v22 }
 0x1ce   :  { %v58_v25 = vrot.slane %v57_v24, 2 }
 0x1d0   :  { %v59_v26 = vadd.f32 %v58_v25, %v57_v24 }
 0x1d2   :  { %v60_v27 = vrot.slane %v59_v26, 1 }
 0x1d4   :  { %v61_v28 = vadd.f32 %v60_v27, %v59_v26 }
 0x1d6   :  { %94 = vpush %v61_v28 }
 0x207   :  { %s95_s0 = spop %94 }
 0x208   :  { %v63_v30 = vstv %s95_s0 }
 0x209   :  { %v64_v31 = vadd.f32 %v63_v30, %v51_v29 }
 0x20b   :  { %66 = vst.msk [vmem:[#allocation2] sm:$0x1] %vm16_vm3, %v64_v31 }
 0x212   :  { %v70_v32 = vld [vmem:[#allocation2] sm:$0x1] }
 0x213   :  { %v72_v33 = vmul.f32 0.125, %v70_v32 }
 0x215   :  { %v73_v34 = vsub.f32 0.0, %v72_v33 }
 0x217   :  { %v74_v35 = vmul.f32 1.442695, %v73_v34 }
 0x219   :  { %104 = vpow2.f32 %v74_v35 }
 0x226   :  { %v105_v36 = vpop.eup %104 }
 0x227   :  { %v76_v37 = vsub.f32 1.0, %v105_v36 }
 0x229   :  { %v77_v38 = vmul.f32 %v76_v37, %v76_v37 }
 0x22b   :  { %v78_v39 = vmul.f32 %v77_v38, %v72_v33 }
 0x22d   :  { %79 = vst.msk [vmem:[#allocation3] sm:$0x1] %vm16_vm3, %v78_v39 }
 0x22e   :  { %117 = shalt.err (!%p114_p4)
}
 0x22f   :  { %89 = dma.vmem_to_hbm [thread:$0]  %s87_s13, 16, %s163_s2, [#allocation4]  }
 0x230   :  { %126 = dma.done.wait [#allocation4], 16  }
 0x231   :  { %127 = vsyncadd [#allocation4], 4294967280 }
 0x232   :  { %93 = vsyncpa [#allocation4], 1 }

</bundles_post_ra>
